<compile_context>
chip_gen: v5e
topology: v5e:2x2
jax: 0.10.0
libtpu: 0.0.40
codegen_flags: <defaults>
</compile_context>

<pallas_src>
import functools
import math

import jax
import jax.numpy as jnp
from jax.experimental import pallas as pl
from jax.experimental.pallas import tpu as pltpu

_LANE = 128  # lane quantum (last dim)


def _round_up(x: int, m: int) -> int:
    return (x + m - 1) // m * m


@functools.lru_cache(maxsize=1)
def _vmem_budget_bytes() -> int:
    """Per-generation scoped-VMEM budget (leaves headroom below physical)."""
    try:
        cap = int(pltpu.get_tpu_info().vmem_capacity_bytes)
    except Exception:
        return 48 * 1024 * 1024                      # safe everywhere
    if cap <= 64 * 1024 * 1024:                      # v7x-class (64 MiB physical)
        return 48 * 1024 * 1024
    return 100 * 1024 * 1024                         # v5e / v6e (128 MiB physical)


def _gelu_tanh(x):
    c = math.sqrt(2.0 / math.pi)
    return 0.5 * x * (1.0 + jnp.tanh(c * (x + 0.044715 * x * x * x)))


# ----------------------------------------------------------------------------
# Kernels. Grid = (row_tiles, e_chunks); e-chunk axis is last and "arbitrary".
# acc_ref is an f32 (tm, H) VMEM scratch that accumulates the second matmul.
# ----------------------------------------------------------------------------
def _ffn_relu_kernel(x_ref, w1_ref, b1_ref, w2_ref, b2_ref, o_ref, acc_ref):
    j = pl.program_id(1)

    @pl.when(j == 0)
    def _():
        acc_ref[...] = jnp.zeros_like(acc_ref)

    h = jnp.dot(x_ref[...], w1_ref[...], preferred_element_type=jnp.float32)
    h = h + b1_ref[...].astype(jnp.float32)
    h = jnp.maximum(h, 0.0)                      # ReLU, f32 on the VPU
    # nn.Dropout(p) is identity in eval mode.
    acc_ref[...] += jnp.dot(h.astype(w2_ref.dtype), w2_ref[...],
                            preferred_element_type=jnp.float32)

    @pl.when(j == pl.num_programs(1) - 1)
    def _():
        o_ref[...] = (acc_ref[...] + b2_ref[...].astype(jnp.float32)).astype(o_ref.dtype)


def _ffn_glu_kernel(x_ref, w1v_ref, w1g_ref, b1v_ref, b1g_ref, w2_ref, b2_ref,
                    o_ref, acc_ref):
    j = pl.program_id(1)

    @pl.when(j == 0)
    def _():
        acc_ref[...] = jnp.zeros_like(acc_ref)

    x = x_ref[...]
    a = jnp.dot(x, w1v_ref[...], preferred_element_type=jnp.float32)
    a = a + b1v_ref[...].astype(jnp.float32)
    g = jnp.dot(x, w1g_ref[...], preferred_element_type=jnp.float32)
    g = g + b1g_ref[...].astype(jnp.float32)
    h = a * _gelu_tanh(g)                        # GEGLU, f32 on VPU + EUP tanh
    # nn.Dropout(p) is identity in eval mode.
    acc_ref[...] += jnp.dot(h.astype(w2_ref.dtype), w2_ref[...],
                            preferred_element_type=jnp.float32)

    @pl.when(j == pl.num_programs(1) - 1)
    def _():
        o_ref[...] = (acc_ref[...] + b2_ref[...].astype(jnp.float32)).astype(o_ref.dtype)


# ----------------------------------------------------------------------------
# Tile selection: biggest chunk of the expansion dim that fits the VMEM budget.
# ----------------------------------------------------------------------------
def _pick_tiles(rows, H, e_half, x_bytes, w_bytes, out_bytes, glu, row_tile, budget):
    sub = 8 if (x_bytes >= 4 and out_bytes >= 4) else 16      # sublane quantum
    tm = max(sub, min(_round_up(row_tile, sub), _round_up(rows, sub)))
    # Keep >= 2 row tiles when possible so the "parallel" axis feeds both v7x TCs.
    if rows > sub and pl.cdiv(rows, tm) < 2:
        tm = _round_up(pl.cdiv(rows, 2), sub)

    # Candidate expansion chunks: e_half itself (full-dim block, always legal)
    # plus every 128-multiple divisor of e_half. Largest that fits wins.
    cands = {e_half}
    k = e_half // _LANE
    while k > 0:
        te = k * _LANE
        if e_half % te == 0:
            cands.add(te)
        k -= 1
    cands = sorted(cands, reverse=True)

    glu_f = 2 if glu else 1

    def vmem_use(te, n_chunks):
        n_wbuf = 1 if n_chunks == 1 else 2       # single-buffer resident weights
        use = 2 * tm * H * x_bytes               # x tile (double buffered)
        use += 2 * tm * H * out_bytes            # out tile (double buffered)
        use += tm * H * 4                        # f32 accumulator scratch
        use += n_wbuf * glu_f * (H * te + te) * w_bytes   # W1 (+gate) and b1 chunks
        use += n_wbuf * te * H * w_bytes         # W2 chunk
        use += H * w_bytes                       # b2 (resident, single buffered)
        use += (glu_f + 2) * tm * te * 4         # f32 hidden temporaries headroom
        return use

    te = cands[-1]
    for cand in cands:
        if vmem_use(cand, e_half // cand) <= int(0.85 * budget):
            te = cand
            break
    return tm, te


# ----------------------------------------------------------------------------
# Wrapper.
# ----------------------------------------------------------------------------
@functools.partial(jax.jit,
                   static_argnames=("activation", "row_tile", "prefer_bfloat16"))
def convolutional_layer(x, w1, b1, w2, b2, *, activation: str = "relu",
                        row_tile: int = 512, prefer_bfloat16: bool = False):
    """Pallas implementation of _ConvolutionalLayer.forward (eval mode).

    x  : (B, S, H)
    w1 : (H, E)  for activation="relu", (H, 2E) for activation="glu"   (torch weight.T)
    b1 : (E,) or (2E,)
    w2 : (E, H)
    b2 : (H,)
    For best lane occupancy H and E should be multiples of 128 in production;
    small dims (like the H=32 test) are still correct, just run with masked lanes.
    """
    B, S, H = x.shape
    E = w2.shape[0]
    e_out = w1.shape[1]
    glu = activation == "glu"
    expected = 2 * E if glu else E
    assert e_out == expected, f"w1 has {e_out} cols, expected {expected}"
    assert b1.shape == (e_out,) and w2.shape == (E, H) and b2.shape == (H,)

    out_dtype = x.dtype
    if prefer_bfloat16:
        # One-time cast outside the kernel (not per tile); f32 MXU accumulation
        # and f32 activation math preserve numerics.
        x = x.astype(jnp.bfloat16)
        w1 = w1.astype(jnp.bfloat16)
        w2 = w2.astype(jnp.bfloat16)

    rows = B * S
    x2d = x.reshape(rows, H)
    b1_2d = b1.reshape(1, e_out)
    b2_2d = b2.reshape(1, H)

    budget = _vmem_budget_bytes()
    tm, te = _pick_tiles(rows, H, E, x.dtype.itemsize, w1.dtype.itemsize,
                         jnp.dtype(out_dtype).itemsize, glu, row_tile, budget)

    # Finalize all tiling scalars BEFORE building index_map closures.
    if glu and E % _LANE != 0:
        # The [value | gate] halves cannot be addressed as lane-aligned column
        # blocks of the shared W1; split the weight once (weight-sized copy,
        # no activation-tensor copies).
        w1v_arr, w1g_arr = w1[:, :E], w1[:, E:]
        b1v_arr, b1g_arr = b1_2d[:, :E], b1_2d[:, E:]
        te, n_e, gate_off = E, 1, 0
    elif glu:
        w1v_arr = w1g_arr = w1          # same array, two column windows
        b1v_arr = b1g_arr = b1_2d
        n_e = E // te
        gate_off = n_e
    else:
        n_e = E // te

    n_row = pl.cdiv(rows, tm)           # ragged last row block is fine (rows independent)
    grid = (n_row, n_e)

    w_mode = pl.Buffered(1) if n_e == 1 else None   # single-buffer constant operands

    def _wspec(shape, index_map):
        if w_mode is None:
            return pl.BlockSpec(shape, index_map)
        return pl.BlockSpec(shape, index_map, pipeline_mode=w_mode)

    x_spec = pl.BlockSpec((tm, H), lambda i, j: (i, 0))
    out_spec = pl.BlockSpec((tm, H), lambda i, j: (i, 0))
    w2_spec = _wspec((te, H), lambda i, j: (j, 0))
    b2_spec = pl.BlockSpec((1, H), lambda i, j: (0, 0), pipeline_mode=pl.Buffered(1))

    if glu:
        kernel = _ffn_glu_kernel
        in_specs = [
            x_spec,
            _wspec((H, te), lambda i, j: (0, j)),               # W1 value columns
            _wspec((H, te), lambda i, j: (0, j + gate_off)),    # W1 gate columns
            _wspec((1, te), lambda i, j: (0, j)),               # b1 value
            _wspec((1, te), lambda i, j: (0, j + gate_off)),    # b1 gate
            w2_spec, b2_spec,
        ]
        operands = (x2d, w1v_arr, w1g_arr, b1v_arr, b1g_arr, w2, b2_2d)
    else:
        kernel = _ffn_relu_kernel
        in_specs = [
            x_spec,
            _wspec((H, te), lambda i, j: (0, j)),               # W1 chunk
            _wspec((1, te), lambda i, j: (0, j)),               # b1 chunk
            w2_spec, b2_spec,
        ]
        operands = (x2d, w1, b1_2d, w2, b2_2d)

    xb = x.dtype.itemsize
    ob = jnp.dtype(out_dtype).itemsize
    cost = pl.CostEstimate(
        flops=2 * rows * H * e_out + 2 * rows * E * H,
        transcendentals=rows * E if glu else 0,
        bytes_accessed=(rows * H * xb + rows * H * ob
                        + H * e_out * w1.dtype.itemsize + e_out * b1.dtype.itemsize
                        + E * H * w2.dtype.itemsize + H * b2.dtype.itemsize),
    )

    out2d = pl.pallas_call(
        kernel,
        out_shape=jax.ShapeDtypeStruct((rows, H), out_dtype),
        grid_spec=pltpu.PrefetchScalarGridSpec(
            num_scalar_prefetch=0,
            grid=grid,
            in_specs=in_specs,
            out_specs=out_spec,
            scratch_shapes=[pltpu.VMEM((tm, H), jnp.float32)],
        ),
        compiler_params=pltpu.CompilerParams(
            dimension_semantics=("parallel", "arbitrary"),
            vmem_limit_bytes=budget,
        ),
        cost_estimate=cost,
    )(*operands)

    return out2d.reshape(B, S, H)


# ----------------------------------------------------------------------------
# Plain-JAX reference (eval-mode forward).
# ----------------------------------------------------------------------------
def _reference(x, w1, b1, w2, b2, activation):
    rows = x.shape[0] * x.shape[1]
    x2 = x.reshape(rows, x.shape[-1])
    h = jnp.dot(x2, w1, preferred_element_type=jnp.float32) + b1.astype(jnp.float32)
    if activation == "glu":
        E = w2.shape[0]
        a, g = h[:, :E], h[:, E:]
        h = a * _gelu_tanh(g)
    else:
        h = jnp.maximum(h, 0.0)
    y = jnp.dot(h.astype(w2.dtype), w2, preferred_element_type=jnp.float32)
    y = y + b2.astype(jnp.float32)
    return y.reshape(x.shape).astype(jnp.float32)


if __name__ == "__main__":
    # Small transformer-block shapes: batch=2, seq=8, hidden=32, expansion=128.
    B, S, H, E = 2, 8, 32, 128
    dropout_rate = 0.1  # identity in eval-mode forward

    key = jax.random.PRNGKey(0)
    ks = jax.random.split(key, 7)
    x = jax.random.normal(ks[0], (B, S, H), dtype=jnp.float32)

    s1 = 1.0 / math.sqrt(H)
    s2 = 1.0 / math.sqrt(E)

    w1 = s1 * jax.random.normal(ks[1], (H, E), dtype=jnp.float32)
    b1 = 0.1 * jax.random.normal(ks[2], (E,), dtype=jnp.float32)
    w2 = s2 * jax.random.normal(ks[3], (E, H), dtype=jnp.float32)
    b2 = 0.1 * jax.random.normal(ks[4], (H,), dtype=jnp.float32)

    # --- default 'relu' activation path (f32) ---
    out = jax.block_until_ready(convolutional_layer(x, w1, b1, w2, b2,
                                                    activation="relu"))
    ref = _reference(x, w1, b1, w2, b2, "relu")
    assert out.shape == (B, S, H)
    assert jnp.allclose(out.astype(jnp.float32), ref, atol=2e-2, rtol=2e-2), \
        "relu path mismatch"

    # --- 'glu' (GEGLU) activation path (f32) ---
    w1g = s1 * jax.random.normal(ks[5], (H, 2 * E), dtype=jnp.float32)
    b1g = 0.1 * jax.random.normal(ks[6], (2 * E,), dtype=jnp.float32)
    outg = jax.block_until_ready(convolutional_layer(x, w1g, b1g, w2, b2,
                                                     activation="glu"))
    refg = _reference(x, w1g, b1g, w2, b2, "glu")
    assert outg.shape == (B, S, H)
    assert jnp.allclose(outg.astype(jnp.float32), refg, atol=2e-2, rtol=2e-2), \
        "glu path mismatch"

    # --- bf16 MXU path (f32 accumulation), relu ---
    outb = jax.block_until_ready(convolutional_layer(x, w1, b1, w2, b2,
                                                     activation="relu",
                                                     prefer_bfloat16=True))
    refb = _reference(x.astype(jnp.bfloat16), w1.astype(jnp.bfloat16), b1,
                      w2.astype(jnp.bfloat16), b2, "relu")
    assert outb.shape == (B, S, H)
    assert jnp.allclose(outb.astype(jnp.float32), refb, atol=5e-2, rtol=5e-2), \
        "bf16 relu path mismatch"

    print("KERNEL_OK")
</pallas_src>

<mosaic_0001>
module attributes {stable_mosaic.version = 11 : i64} {
  func.func @_ffn_relu_kernel(%arg0: i32, %arg1: i32, %arg2: memref<8x32xf32, #tpu.memory_space<vmem>>, %arg3: memref<32x128xf32, #tpu.memory_space<vmem>>, %arg4: memref<1x128xf32, #tpu.memory_space<vmem>>, %arg5: memref<128x32xf32, #tpu.memory_space<vmem>>, %arg6: memref<1x32xf32, #tpu.memory_space<vmem>>, %arg7: memref<8x32xf32, #tpu.memory_space<vmem>>, %arg8: memref<8x32xf32, #tpu.memory_space<vmem>>) attributes {dimension_semantics = [#tpu.dimension_semantics<parallel>, #tpu.dimension_semantics<arbitrary>], iteration_bounds = array<i64: 2, 1>, scalar_prefetch = 0 : i64, scratch_operands = 1 : i64, tpu.core_type = #tpu.core_type<tc>, window_params = [{transform_indices = @transform_0, window_bounds = array<i64: 8, 32>}, {pipeline_mode = #tpu.pipeline_mode<synchronous>, transform_indices = @transform_1, window_bounds = array<i64: 32, 128>}, {pipeline_mode = #tpu.pipeline_mode<synchronous>, transform_indices = @transform_2, window_bounds = array<i64: 1, 128>}, {pipeline_mode = #tpu.pipeline_mode<synchronous>, transform_indices = @transform_3, window_bounds = array<i64: 128, 32>}, {pipeline_mode = #tpu.pipeline_mode<synchronous>, transform_indices = @transform_4, window_bounds = array<i64: 1, 32>}, {transform_indices = @transform_5, window_bounds = array<i64: 8, 32>}]} {
    %c0_i32 = arith.constant 0 : i32
    %0 = arith.cmpi eq, %arg1, %c0_i32 : i32
    %1 = arith.extui %0 : i1 to i32
    %c0_i32_0 = arith.constant 0 : i32
    %2 = arith.cmpi ne, %1, %c0_i32_0 : i32
    scf.if %2 {
      %cst_16 = arith.constant 0.000000e+00 : f32
      %19 = vector.broadcast %cst_16 : f32 to vector<8x32xf32>
      %c0_17 = arith.constant 0 : index
      %c0_18 = arith.constant 0 : index
      %20 = vector.load %arg8[%c0_17, %c0_18] : memref<8x32xf32, #tpu.memory_space<vmem>>, vector<8x32xf32>
      tpu.vector_store %arg8[%c0_17, %c0_18], %19 {strides = array<i32>} : memref<8x32xf32, #tpu.memory_space<vmem>>, vector<8x32xf32>,
    } else {
    }
    %c0 = arith.constant 0 : index
    %c0_1 = arith.constant 0 : index
    %3 = vector.load %arg2[%c0, %c0_1] : memref<8x32xf32, #tpu.memory_space<vmem>>, vector<8x32xf32>
    %c0_2 = arith.constant 0 : index
    %c0_3 = arith.constant 0 : index
    %4 = vector.load %arg3[%c0_2, %c0_3] : memref<32x128xf32, #tpu.memory_space<vmem>>, vector<32x128xf32>
    %cst = arith.constant dense<0.000000e+00> : vector<8x128xf32>
    %5 = tpu.matmul %3, %4, %cst {dimension_numbers = #tpu.dot_dimension_numbers<[1], [0], [0], [1], [0, 0, 1, 1], [], []>} : vector<8x32xf32>, vector<32x128xf32>, vector<8x128xf32> -> vector<8x128xf32>
    %c0_4 = arith.constant 0 : index
    %c0_5 = arith.constant 0 : index
    %6 = vector.load %arg4[%c0_4, %c0_5] : memref<1x128xf32, #tpu.memory_space<vmem>>, vector<1x128xf32>
    %7 = vector.broadcast %6 : vector<1x128xf32> to vector<8x128xf32>
    %8 = arith.addf %5, %7 : vector<8x128xf32>
    %cst_6 = arith.constant 0.000000e+00 : f32
    %9 = vector.broadcast %cst_6 : f32 to vector<8x128xf32>
    %10 = arith.maximumf %8, %9 : vector<8x128xf32>
    %c0_7 = arith.constant 0 : index
    %c0_8 = arith.constant 0 : index
    %11 = vector.load %arg8[%c0_7, %c0_8] : memref<8x32xf32, #tpu.memory_space<vmem>>, vector<8x32xf32>
    %c0_9 = arith.constant 0 : index
    %c0_10 = arith.constant 0 : index
    %12 = vector.load %arg5[%c0_9, %c0_10] : memref<128x32xf32, #tpu.memory_space<vmem>>, vector<128x32xf32>
    %cst_11 = arith.constant dense<0.000000e+00> : vector<8x32xf32>
    %13 = tpu.matmul %10, %12, %cst_11 {dimension_numbers = #tpu.dot_dimension_numbers<[1], [0], [0], [1], [0, 0, 1, 1], [], []>} : vector<8x128xf32>, vector<128x32xf32>, vector<8x32xf32> -> vector<8x32xf32>
    %14 = arith.addf %11, %13 : vector<8x32xf32>
    %c0_12 = arith.constant 0 : index
    %c0_13 = arith.constant 0 : index
    %15 = vector.load %arg8[%c0_12, %c0_13] : memref<8x32xf32, #tpu.memory_space<vmem>>, vector<8x32xf32>
    tpu.vector_store %arg8[%c0_12, %c0_13], %14 {strides = array<i32>} : memref<8x32xf32, #tpu.memory_space<vmem>>, vector<8x32xf32>,
    %c0_i32_14 = arith.constant 0 : i32
    %16 = arith.cmpi eq, %arg1, %c0_i32_14 : i32
    %17 = arith.extui %16 : i1 to i32
    %c0_i32_15 = arith.constant 0 : i32
    %18 = arith.cmpi ne, %17, %c0_i32_15 : i32
    scf.if %18 {
      %c0_16 = arith.constant 0 : index
      %c0_17 = arith.constant 0 : index
      %19 = vector.load %arg8[%c0_16, %c0_17] : memref<8x32xf32, #tpu.memory_space<vmem>>, vector<8x32xf32>
      %c0_18 = arith.constant 0 : index
      %c0_19 = arith.constant 0 : index
      %20 = vector.load %arg6[%c0_18, %c0_19] : memref<1x32xf32, #tpu.memory_space<vmem>>, vector<1x32xf32>
      %21 = vector.broadcast %20 : vector<1x32xf32> to vector<8x32xf32>
      %22 = arith.addf %19, %21 : vector<8x32xf32>
      %c0_20 = arith.constant 0 : index
      %c0_21 = arith.constant 0 : index
      %23 = vector.load %arg7[%c0_20, %c0_21] : memref<8x32xf32, #tpu.memory_space<vmem>>, vector<8x32xf32>
      tpu.vector_store %arg7[%c0_20, %c0_21], %22 {strides = array<i32>} : memref<8x32xf32, #tpu.memory_space<vmem>>, vector<8x32xf32>,
    } else {
    }
    return
  }
  func.func @transform_0(%arg0: i32, %arg1: i32) -> (i32, i32) {
    %c0_i32 = arith.constant 0 : i32
    %c0_i32_0 = arith.constant 0 : i32
    return %arg0, %c0_i32 : i32, i32
  }
  func.func @transform_1(%arg0: i32, %arg1: i32) -> (i32, i32) {
    %c0_i32 = arith.constant 0 : i32
    %c0_i32_0 = arith.constant 0 : i32
    return %c0_i32, %arg1 : i32, i32
  }
  func.func @transform_2(%arg0: i32, %arg1: i32) -> (i32, i32) {
    %c0_i32 = arith.constant 0 : i32
    %c0_i32_0 = arith.constant 0 : i32
    return %c0_i32, %arg1 : i32, i32
  }
  func.func @transform_3(%arg0: i32, %arg1: i32) -> (i32, i32) {
    %c0_i32 = arith.constant 0 : i32
    %c0_i32_0 = arith.constant 0 : i32
    return %arg1, %c0_i32 : i32, i32
  }
  func.func @transform_4(%arg0: i32, %arg1: i32) -> (i32, i32) {
    %c0_i32 = arith.constant 0 : i32
    %c0_i32_0 = arith.constant 0 : i32
    %c0_i32_1 = arith.constant 0 : i32
    return %c0_i32, %c0_i32_0 : i32, i32
  }
  func.func @transform_5(%arg0: i32, %arg1: i32) -> (i32, i32) {
    %c0_i32 = arith.constant 0 : i32
    %c0_i32_0 = arith.constant 0 : i32
    return %arg0, %c0_i32 : i32, i32
  }
}

</mosaic_0001>

<bundles_post_ra>
// kernel: convolutional_layer.1
= control target key start
LH: loop header
LB: loop body
LE: loop exit
PB: predicated region body
PF: predicated region fallthrough
CT: control target
= control target key end

     0   :  { %10 = vsyncpa [#allocation4], 0  ;;  %s850_s0 = inlined_call_operand.vmem [shape: f32[16,32], index: 0, kind: input, shape index: {}]   ;;  %s851_s1 = inlined_call_operand.vmem [shape: f32[32,128], index: 1, kind: input, shape index: {}]   ;;  %s852_s2 = inlined_call_operand.vmem [shape: f32[1,128], index: 2, kind: input, shape index: {}]   ;;  %s853_s3 = inlined_call_operand.vmem [shape: f32[128,32], index: 3, kind: input, shape index: {}]   ;;  %s854_s4 = inlined_call_operand.vmem [shape: f32[1,32], index: 4, kind: input, shape index: {}]   ;;  %s855_s5 = inlined_call_operand.hbm [shape: f32[16,32], index: 5, kind: output, shape index: {}]  }
   0x1   :  { %12 = vsyncpa [#allocation4 + $0x1], 0  ;;  %s683_s18 = smov 0   ;;  %s685_s19 = smov 0  }
   0x2   :  { %s687_s20 = smov 0   ;;  %s689_s21 = smov 0  }
   0x3   :  { %s691_s22 = smov 0   ;;  %s693_s23 = smov 0  }
   0x4 LB: > { %s499_s24 = sadd.s32 4294967295, %s650_s23   ;;  %s500_s25 = sadd.s32 4294967294, %s650_s23   ;;  %s650_s23 = sphi %s693_s23, %s18_s23   ;;  %s646_s22 = sphi %s691_s22, %s862_s22   ;;  %s642_s21 = sphi %s689_s21, %s861_s21   ;;  %s638_s20 = sphi %s687_s20, %s860_s20   ;;  %s634_s19 = sphi %s685_s19, %s859_s19   ;;  %s630_s18 = sphi %s683_s18, %s858_s18  }
   0x5   : > { %s30_s26 = sadd.s32 1, %s646_s22  ;;  %s162_s27 = sadd.s32 1, %s638_s20 }
   0x6   : > { %p32_p0 = scmp.ge.s32.totalorder %s30_s26, 2  ;;  %p172_p1 = scmp.ne.s32.totalorder %s638_s20, %s634_s19 }
   0x7   : > { %p173_p2 = scmp.eq.s32.totalorder %s499_s24, 1  ;;  %p178_p3 = scmp.ne.s32.totalorder %s634_s19, %s630_s18 }
   0x8   : > { %s864_s26 = smov (%p32_p0, %s30_s26), 0  ;;  %p179_p5 = scmp.eq.s32.totalorder %s500_s25, 1 }
   0x9   : > { %p723_p4 = por %p173_p2, %p172_p1  ;;  %s159_s29 = ssub.s32 %s646_s22, %s864_s26 }
   0xa   : > { %p506_p6 = scmp.ge.s32.totalorder %s650_s23, 1  ;;  %p160_p7 = scmp.eq.s32.totalorder %s159_s29, 0 }
   0xb   : > { %p730_p8 = por %p179_p5, %p178_p3  ;;  %p229_p9 = scmp.lt.s32.totalorder %s650_s23, 3 }
   0xc   : > { %s736_s6 = scalar_select %p160_p7, %s638_s20, %s162_s27  }
   0xd   : > { %p230_p10 = pnand %p506_p6, %p229_p9 }
   0xe   : > { %p268_p11 = scmp.lt.s32.totalorder (!%p230_p10), %s642_s21, 1  ;;  %s265_s9 = sand.u32 (!%p230_p10), 1, %s634_s19  }
   0xf   : > { %233 = sbr.rel (%p230_p10) target bundleno = 299 (0x12b), region = 40  ;;  %s511_s11 = sshll.u32 (!%p230_p10), %s642_s21, 3 }
  0x10   : > { %s385_s14 = scalar_lea.hbm (!%p230_p10), %s855_s5, %s511_s11 }
  0x11   : > { %s389_s25 = sshll.u32 (!%p230_p10), %s385_s14, 4  ;;  %s390_s25 = int_to_ptr.hbm [resolvable:$true] %s389_s25 }
  0x12   : > { %s586_s27 = sshra.s32 (!%p230_p10), %s390_s25, 4  ;;  %s587_s27 = int_to_ptr.hbm [resolvable:$true] %s586_s27 }
  0x13   : > { %s588_s29 = scalar_lea.hbm (!%p230_p10), %s587_s27, 8  ;;  %p593_p1 = scmp.lt.s32.totalorder (!%p230_p10), %s587_s27, %s855_s5 }
  0x14   : > { %v295_v0 = vld [vmem:[%s851_s1 + $0x18] sm:$0xff]  ;;  %v294_v1 = vld [vmem:[%s851_s1 + $0x10] sm:$0xff]  ;;  %vm289_vm0 = vcmask 261120   ;;  %v652_v2 = vmov 0.0   ;;  %v293_v5 = vld [vmem:[%s851_s1 + $0x8] sm:$0xff]  ;;  %s269_s17 = scalar_select %p268_p11, %s642_s21, 1 }
  0x15   : > { %316 = vmatpush.msra.mxu0 %v295_v0  ;;  %290 = vst.msk [vmem:[#allocation2] sm:$0xff] %vm289_vm0, %v652_v2  ;;  %v341_v3 = vld [vmem:[%s853_s3 + $0x78] sm:$0xff]  ;;  %v340_v4 = vld [vmem:[%s853_s3 + $0x70] sm:$0xff]  ;;  %v339_v6 = vld [vmem:[%s853_s3 + $0x68] sm:$0xff]  ;;  %s375_s21 = scalar_lea.sflag [#allocation4], %s265_s9  ;;  %p589_p12 = scmp.ne.s32.totalorder %s587_s27, %s588_s29 }
  0x16   : > { %342 = vmatpush.msra.mxu1 %v341_v3  ;;  %v292_v7 = vld [vmem:[%s851_s1] sm:$0xff]  ;;  %s508_s7 = sshll.u32 %s269_s17, 3  ;;  %v337_v10 = vld [vmem:[%s853_s3 + $0x58] sm:$0xff]  ;;  %v336_v11 = vld [vmem:[%s853_s3 + $0x50] sm:$0xff] }
  0x17   : > { %317 = vmatpush.msra.mxu0 %v294_v1  ;;  %s271_s10 = scalar_lea.vmem %s850_s0, %s508_s7  ;;  %v338_v8 = vld [vmem:[%s853_s3 + $0x60] sm:$0xff]  ;;  %v335_v12 = vld [vmem:[%s853_s3 + $0x48] sm:$0xff]  ;;  %v333_v14 = vld [vmem:[%s853_s3 + $0x38] sm:$0xff]  ;;  %p590_p13 = pnand %p589_p12, %p723_p4 }
  0x18   : > { %343 = vmatpush.msra.mxu1 %v340_v4  ;;  %v291_v9 = vld [vmem:[%s271_s10] sm:$0xff]  ;;  %v332_v15 = vld [vmem:[%s853_s3 + $0x30] sm:$0xff]  ;;  %v331_v16 = vld [vmem:[%s853_s3 + $0x28] sm:$0xff]  ;;  %s507_s10 = sshll.u32 %s265_s9, 3 }
  0x19   : > { %318 = vmatpush.msra.mxu0 %v293_v5  ;;  %v334_v13 = vld [vmem:[%s853_s3 + $0x40] sm:$0xff]  ;;  %v329_v18 = vld [vmem:[%s853_s3 + $0x18] sm:$0xff]  ;;  %v328_v19 = vld [vmem:[%s853_s3 + $0x10] sm:$0xff]  ;;  %s267_s17 = scalar_lea.vmem [#allocation3], %s507_s10  ;;  %p591_p0 = pneg %p590_p13 }
  0x1a   : > { %344 = vmatpush.msra.mxu1 %v339_v6  ;;  %v330_v17 = vld [vmem:[%s853_s3 + $0x20] sm:$0xff]  ;;  %v327_v20 = vld [vmem:[%s853_s3 + $0x8] sm:$0xff]  ;;  %s387_s24 = sshll.u32 %s267_s17, 4  ;;  %s592_s10 = scalar_lea.hbm %s855_s5, 16  ;;  %s388_s24 = int_to_ptr.vmem [resolvable:$true] %s387_s24 }
  0x1b   : > { %319 = vmatpush.msra.mxu0 %v292_v7  ;;  %v326_v21 = vld [vmem:[%s853_s3] sm:$0xff]  ;;  %p594_p2 = scmp.lt.s32.totalorder %s592_s10, %s588_s29 }
  0x1c   : > { %509 = vmatmul.msk.f32.vlgmr.msra.gmra.mxu0 %vm289_vm0, %v291_v9  ;;  %345 = vmatpush.msra.mxu1 %v338_v8  ;;  %v570_v22 = vld [vmem:[%s852_s2] ss:$0 sm:$0xff] }
  0x1d   : > { %v325_v26 = vld [vmem:[#allocation2] sm:$0xff]  ;;  %p595_p3 = por %p594_p2, %p593_p1 }
  0x1e   : > { %346 = vmatpush.msra.mxu1 %v337_v10  ;;  %v571_v29 = vld [vmem:[%s854_s4] ss:$0 sm:$0xff] }
  0x1f   : > { %p596_p5 = pnand %p595_p3, %p591_p0 }
  0x20   : > { %347 = vmatpush.msra.mxu1 %v336_v11 }
  0x22   : > { %348 = vmatpush.msra.mxu1 %v335_v12 }
  0x24   : > { %349 = vmatpush.msra.mxu1 %v334_v13 }
  0x26   : > { %350 = vmatpush.msra.mxu1 %v333_v14 }
  0x28   : > { %351 = vmatpush.msra.mxu1 %v332_v15 }
  0x2a   : > { %352 = vmatpush.msra.mxu1 %v331_v16 }
  0x2c   : > { %353 = vmatpush.msra.mxu1 %v330_v17 }
  0x2e   : > { %354 = vmatpush.msra.mxu1 %v329_v18 }
  0x30   : > { %355 = vmatpush.msra.mxu1 %v328_v19 }
  0x32   : > { %356 = vmatpush.msra.mxu1 %v327_v20 }
  0x34   : > { %357 = vmatpush.msra.mxu1 %v326_v21 }
  0x99   : > { %v321_v23 = vpop.f32.mrf.mxu0 }
  0x9a   : > { %v322_v24 = vadd.f32 %v570_v22, %v321_v23 }
  0x9c   : > { %v324_v25 = vmax.f32 %v322_v24, 0.0 }
  0x9e   : > { %358 = vmatmul.f32.vlgmr.msra.gmra.mxu1 %v324_v25 }
 0x11b   : > { %v359_v27 = vpop.f32.mrf.mxu1 }
 0x11c   : > { %v362_v28 = vadd.f32 %v359_v27, %v325_v26 }
 0x11e   : > { %363 = vst.msk [vmem:[#allocation2] sm:$0xff] %vm289_vm0, %v362_v28 }
 0x125   : > { %v367_v30 = vld [vmem:[#allocation2] sm:$0xff] }
 0x126   : > { %v372_v31 = vadd.f32 %v571_v29, %v367_v30 }
 0x128   : > { %373 = vst.msk [vmem:[%s267_s17] sm:$0xff] %vm289_vm0, %v372_v31 }
 0x129   : > { %599 = shalt.err (!%p596_p5)
}
 0x12a   : > { %514 = dma.vmem_to_hbm [thread:$0]  (%p723_p4), %s388_s24, 128, %s390_s25, %s375_s21  }
 0x12b PF: > { %p520_p6 = scmp.ge.s32.totalorder %s650_s23, 2  ;;  %s401_s9 = sand.u32 1, %s630_s18  }
 0x12c   : > { %s402_s13 = scalar_lea.sflag [#allocation4], %s401_s9 }
 0x12d   : > { %p517_p7 = pnand %p520_p6, %p730_p8 }
 0x12f   : > { %p518_p9 = pneg %p517_p7 }
 0x131   : > { %625 = dma.done.wait (%p518_p9), %s402_s13, 128  }
 0x132   : > { %627 = vsyncadd (%p518_p9), %s402_s13, 4294967168  ;;  %s18_s23 = sadd.s32 1, %s650_s23   ;;  %s858_s18 = smov %s634_s19 }
 0x133   : > { %p15_p10 = scmp.ge.s32.totalorder %s18_s23, 4   ;;  %s859_s19 = smov %s638_s20 }
 0x134   : > { %s860_s20 = smov %s736_s6  ;;  %s861_s21 = smov %s646_s22 }
 0x135   : > { %s862_s22 = smov %s864_s26  ;;  %17 = sbr.rel (!%p15_p10) target bundleno = 4 (0x4), region = 92 }
 0x13a   :  { %408 = vsyncpa [#allocation4], 1 }
 0x13b   :  { %410 = vsyncpa [#allocation4 + $0x1], 1 }

</bundles_post_ra>
